<compile_context>
chip_gen: v7x
topology: tpu7x:2x2x1
jax: 0.10.0
libtpu: 0.0.40
codegen_flags: <defaults>
</compile_context>

<pallas_src>
import functools

import jax
import jax.numpy as jnp
from jax.experimental import pallas as pl
from jax.experimental.pallas import tpu as pltpu


def _make_kernel(tb, k, la, lc, ne, w):
    """Kernel for one batch tile of `tb` users, packed lane-dense output."""
    pad_w = w - (k + la + lc)

    def kernel(ids_a_ref, ids_c_ref, users_ref, relk_ref, ent_ref, out_ref):
        users = users_ref[...].astype(jnp.float32)          # [TB, F]
        relk = relk_ref[...].astype(jnp.float32)            # [F, K]
        ent = ent_ref[...].astype(jnp.float32)              # [NE, F] (resident)

        # ---- aspect-importance scores: relu(users @ relation_k) -> softmax ----
        logits = jnp.dot(users, relk, preferred_element_type=jnp.float32)
        logits = jnp.maximum(logits, 0.0)                   # LeakyReLU(slope=0.0)
        m = jnp.max(logits, axis=1, keepdims=True)
        e = jnp.exp(logits - m)
        scores = e / jnp.sum(e, axis=1, keepdims=True)      # [TB, K]

        # ---- ratings against every entity on the MXU (lane-dense [TB, NE]) ----
        ratings = jax.lax.dot_general(
            users, ent, (((1,), (1,)), ((), ())),
            preferred_element_type=jnp.float32)             # users @ ent.T
        r3 = ratings[:, None, :]                            # hoisted broadcast

        # ---- select the listed entities' ratings with a one-hot mask ----
        ids_a = ids_a_ref[0]                                # [TB, LA] int32
        ids_c = ids_c_ref[0]                                # [TB, LC] int32
        iota_a = jax.lax.broadcasted_iota(jnp.int32, (tb, la, ne), 2)
        iota_c = jax.lax.broadcasted_iota(jnp.int32, (tb, lc, ne), 2)
        na = jnp.sum(jnp.where(ids_a[:, :, None] == iota_a, r3, 0.0), axis=2)
        nc = jnp.sum(jnp.where(ids_c[:, :, None] == iota_c, r3, 0.0), axis=2)

        # ---- single full-width (unmasked) packed store ----
        zpad = jnp.zeros((tb, pad_w), jnp.float32)
        out_ref[...] = jnp.concatenate([scores, na, nc, zpad], axis=1)

    return kernel


@functools.partial(jax.jit, static_argnames=("training", "tile_b"))
def aspect_augumentation_book_forward(params, user_id, artists_id,
                                      categories_id, rate, training=False,
                                      tile_b=8):
    del rate, training  # dropout == identity in eval mode

    user_f = params["user_factors"]        # [n_users, F]
    ent_f = params["entity_factors"]       # [n_entity, F]  (VMEM-resident)
    relk = params["relation_k"]            # [F, K]

    B = user_id.shape[0]
    LA = artists_id.shape[1]
    LC = categories_id.shape[1]
    NE, F = ent_f.shape
    K = relk.shape[1]
    W = max(128, -(-(K + LA + LC) // 128) * 128)   # lane-dense packed width

    # Batch tile: multiple of 8 sublanes; keep >=2 tiles when B allows so the
    # "parallel" grid axis gives both v7x TensorCores work.
    TB = max(8, (int(tile_b) // 8) * 8)
    if B > 8:
        half = -(-B // 2)
        TB = min(TB, -(-half // 8) * 8)
    n_tiles = -(-B // TB)
    B_pad = n_tiles * TB
    pad = B_pad - B

    users = user_f[user_id]                # [B, F] user gather (small; XLA)
    ids_a = artists_id.astype(jnp.int32)
    ids_c = categories_id.astype(jnp.int32)
    if pad:
        users = jnp.concatenate([users, jnp.zeros((pad, F), users.dtype)], axis=0)
        ids_a = jnp.concatenate([ids_a, jnp.zeros((pad, LA), jnp.int32)], axis=0)
        ids_c = jnp.concatenate([ids_c, jnp.zeros((pad, LC), jnp.int32)], axis=0)
    ids_a = ids_a.reshape(n_tiles, TB, LA)   # per-tile id blocks (no scalar prefetch)
    ids_c = ids_c.reshape(n_tiles, TB, LC)

    packed = pl.pallas_call(
        _make_kernel(TB, K, LA, LC, NE, W),
        out_shape=jax.ShapeDtypeStruct((B_pad, W), jnp.float32),
        grid_spec=pltpu.PrefetchScalarGridSpec(
            num_scalar_prefetch=0,
            grid=(n_tiles,),
            in_specs=[
                pl.BlockSpec((1, TB, LA), lambda i: (i, 0, 0)),   # artist ids
                pl.BlockSpec((1, TB, LC), lambda i: (i, 0, 0)),   # category ids
                pl.BlockSpec((TB, F), lambda i: (i, 0)),          # users (pipelined)
                pl.BlockSpec((F, K), lambda i: (0, 0)),           # relation_k resident
                pl.BlockSpec((NE, F), lambda i: (0, 0)),          # entity_factors resident
            ],
            out_specs=pl.BlockSpec((TB, W), lambda i: (i, 0)),    # lane-dense slab
        ),
        compiler_params=pltpu.CompilerParams(
            dimension_semantics=("parallel",),      # megacore shards batch tiles
            vmem_limit_bytes=48 * 1024 * 1024,      # > 16/32 MiB scoped defaults,
        ),                                          # < v7x 64 MiB physical
    )(ids_a, ids_c, users, relk, ent_f)

    packed = packed[:B]
    scores = packed[:, :K]
    na = packed[:, K:K + LA]
    nc = packed[:, K + LA:K + LA + LC]

    # Skinny [B] epilogue in XLA (avoids masked [B,1] stores in the kernel).
    s_a = scores[:, 0]
    s_c = scores[:, 1]
    contribute_actors = jnp.mean(na, axis=1)
    contribute_directors = jnp.mean(nc, axis=1)
    prediction = (contribute_actors * s_a + contribute_directors * s_c) / (s_a + s_c)
    cnm = [na[:, :, None], nc[:, :, None]]   # per-aspect [B, L, 1] rating stacks
    return prediction, scores, contribute_actors, contribute_directors, cnm


def _reference_forward(params, user_id, artists_id, categories_id):
    """Pure-JAX reference (eval-mode semantics of the PyTorch module)."""
    users = params["user_factors"][user_id].astype(jnp.float32)
    relk = params["relation_k"].astype(jnp.float32)
    logits = jnp.maximum(users @ relk, 0.0)
    scores = jax.nn.softmax(logits, axis=1)
    ea = params["entity_factors"][artists_id].astype(jnp.float32)
    ec = params["entity_factors"][categories_id].astype(jnp.float32)
    na = jnp.sum(ea * users[:, None, :], axis=-1)
    nc = jnp.sum(ec * users[:, None, :], axis=-1)
    ca = na.mean(axis=1)
    cc = nc.mean(axis=1)
    s_a = scores[:, 0]
    s_c = scores[:, 1]
    pred = (ca * s_a + cc * s_c) / (s_a + s_c)
    return pred, scores, ca, cc, na, nc


if __name__ == "__main__":
    n_users, n_entity, n_rk, n_factors = 10, 20, 3, 32
    B, LA, LC = 12, 5, 4   # B not a multiple of the tile -> padding + 2 tiles

    key = jax.random.PRNGKey(0)
    kp, ku, ka, kc = jax.random.split(key, 4)
    k1, k2, k3 = jax.random.split(kp, 3)

    # torch.nn.Embedding default init: N(0, 1)
    params = {
        "user_factors": jax.random.normal(k1, (n_users, n_factors), jnp.float32),
        "entity_factors": jax.random.normal(k2, (n_entity, n_factors), jnp.float32),
        "relation_k": jax.random.normal(k3, (n_factors, n_rk), jnp.float32),
    }
    user_id = jax.random.randint(ku, (B,), 0, n_users, dtype=jnp.int32)
    artists_id = jax.random.randint(ka, (B, LA), 0, n_entity, dtype=jnp.int32)
    categories_id = jax.random.randint(kc, (B, LC), 0, n_entity, dtype=jnp.int32)
    rate = 0.5

    prediction, scores, c_act, c_dir, cnm = aspect_augumentation_book_forward(
        params, user_id, artists_id, categories_id, rate)
    jax.block_until_ready(prediction)
    jax.block_until_ready(scores)
    jax.block_until_ready(cnm[0])
    jax.block_until_ready(cnm[1])

    ref_pred, ref_scores, ref_ca, ref_cc, ref_na, ref_nc = _reference_forward(
        params, user_id, artists_id, categories_id)

    assert prediction.shape == (B,)
    assert scores.shape == (B, n_rk)
    assert c_act.shape == (B,) and c_dir.shape == (B,)
    assert cnm[0].shape == (B, LA, 1) and cnm[1].shape == (B, LC, 1)
    assert bool(jnp.allclose(scores, ref_scores, rtol=5e-3, atol=5e-3))
    assert bool(jnp.allclose(cnm[0][..., 0], ref_na, rtol=5e-3, atol=5e-3))
    assert bool(jnp.allclose(cnm[1][..., 0], ref_nc, rtol=5e-3, atol=5e-3))
    assert bool(jnp.allclose(c_act, ref_ca, rtol=5e-3, atol=5e-3))
    assert bool(jnp.allclose(c_dir, ref_cc, rtol=5e-3, atol=5e-3))
    assert bool(jnp.allclose(prediction, ref_pred, rtol=5e-3, atol=5e-3))
    print("KERNEL_OK")
</pallas_src>

<mosaic_0001>
module attributes {stable_mosaic.version = 11 : i64} {
  func.func @kernel(%arg0: i32, %arg1: memref<1x8x5xi32, #tpu.memory_space<vmem>>, %arg2: memref<1x8x4xi32, #tpu.memory_space<vmem>>, %arg3: memref<8x32xf32, #tpu.memory_space<vmem>>, %arg4: memref<32x3xf32, #tpu.memory_space<vmem>>, %arg5: memref<20x32xf32, #tpu.memory_space<vmem>>, %arg6: memref<8x128xf32, #tpu.memory_space<vmem>>) attributes {dimension_semantics = [#tpu.dimension_semantics<parallel>], iteration_bounds = array<i64: 2>, scalar_prefetch = 0 : i64, scratch_operands = 0 : i64, tpu.core_type = #tpu.core_type<tc>, window_params = [{transform_indices = @transform_0, window_bounds = array<i64: 1, 8, 5>}, {transform_indices = @transform_1, window_bounds = array<i64: 1, 8, 4>}, {transform_indices = @transform_2, window_bounds = array<i64: 8, 32>}, {pipeline_mode = #tpu.pipeline_mode<synchronous>, transform_indices = @transform_3, window_bounds = array<i64: 32, 3>}, {pipeline_mode = #tpu.pipeline_mode<synchronous>, transform_indices = @transform_4, window_bounds = array<i64: 20, 32>}, {transform_indices = @transform_5, window_bounds = array<i64: 8, 128>}]} {
    %c0 = arith.constant 0 : index
    %c0_0 = arith.constant 0 : index
    %0 = vector.load %arg3[%c0, %c0_0] : memref<8x32xf32, #tpu.memory_space<vmem>>, vector<8x32xf32>
    %c0_1 = arith.constant 0 : index
    %c0_2 = arith.constant 0 : index
    %1 = vector.load %arg4[%c0_1, %c0_2] : memref<32x3xf32, #tpu.memory_space<vmem>>, vector<32x3xf32>
    %c0_3 = arith.constant 0 : index
    %c0_4 = arith.constant 0 : index
    %2 = vector.load %arg5[%c0_3, %c0_4] : memref<20x32xf32, #tpu.memory_space<vmem>>, vector<20x32xf32>
    %cst = arith.constant dense<0.000000e+00> : vector<8x3xf32>
    %3 = tpu.matmul %0, %1, %cst {dimension_numbers = #tpu.dot_dimension_numbers<[1], [0], [0], [1], [0, 0, 1, 1], [], []>} : vector<8x32xf32>, vector<32x3xf32>, vector<8x3xf32> -> vector<8x3xf32>
    %cst_5 = arith.constant 0.000000e+00 : f32
    %4 = vector.broadcast %cst_5 : f32 to vector<8x3xf32>
    %5 = arith.maximumf %3, %4 : vector<8x3xf32>
    %cst_6 = arith.constant dense<0xFF800000> : vector<8xf32>
    %6 = vector.multi_reduction <maximumf>, %5, %cst_6 [1] : vector<8x3xf32> to vector<8xf32>
    %7 = vector.shape_cast %6 : vector<8xf32> to vector<8x1xf32>
    %8 = vector.broadcast %7 : vector<8x1xf32> to vector<8x3xf32>
    %9 = arith.subf %5, %8 : vector<8x3xf32>
    %10 = math.exp %9 : vector<8x3xf32>
    %cst_7 = arith.constant dense<0.000000e+00> : vector<8xf32>
    %11 = vector.multi_reduction <add>, %10, %cst_7 [1] : vector<8x3xf32> to vector<8xf32>
    %12 = vector.shape_cast %11 : vector<8xf32> to vector<8x1xf32>
    %13 = vector.broadcast %12 : vector<8x1xf32> to vector<8x3xf32>
    %14 = arith.divf %10, %13 : vector<8x3xf32>
    %cst_8 = arith.constant dense<0.000000e+00> : vector<8x20xf32>
    %15 = tpu.matmul %0, %2, %cst_8 {dimension_numbers = #tpu.dot_dimension_numbers<[1], [1], [0], [0], [0, 0, 1, 0], [], []>} : vector<8x32xf32>, vector<20x32xf32>, vector<8x20xf32> -> vector<8x20xf32>
    %16 = vector.shape_cast %15 : vector<8x20xf32> to vector<8x1x20xf32>
    %c0_9 = arith.constant 0 : index
    %c0_10 = arith.constant 0 : index
    %c0_11 = arith.constant 0 : index
    %17 = vector.load %arg1[%c0_9, %c0_10, %c0_11] : memref<1x8x5xi32, #tpu.memory_space<vmem>>, vector<1x8x5xi32>
    %18 = vector.shape_cast %17 : vector<1x8x5xi32> to vector<8x5xi32>
    %c0_12 = arith.constant 0 : index
    %c0_13 = arith.constant 0 : index
    %c0_14 = arith.constant 0 : index
    %19 = vector.load %arg2[%c0_12, %c0_13, %c0_14] : memref<1x8x4xi32, #tpu.memory_space<vmem>>, vector<1x8x4xi32>
    %20 = vector.shape_cast %19 : vector<1x8x4xi32> to vector<8x4xi32>
    %21 = tpu.iota {dimensions = array<i32: 2>} : vector<8x5x20xi32>
    %22 = tpu.iota {dimensions = array<i32: 2>} : vector<8x4x20xi32>
    %23 = vector.shape_cast %18 : vector<8x5xi32> to vector<8x5x1xi32>
    %24 = vector.broadcast %23 : vector<8x5x1xi32> to vector<8x5x20xi32>
    %25 = arith.cmpi eq, %24, %21 : vector<8x5x20xi32>
    %cst_15 = arith.constant 0.000000e+00 : f32
    %26 = vector.shape_cast %16 : vector<8x1x20xf32> to vector<8x1x20xf32>
    %27 = vector.broadcast %26 : vector<8x1x20xf32> to vector<8x5x20xf32>
    %28 = vector.broadcast %cst_15 : f32 to vector<8x5x20xf32>
    %29 = arith.select %25, %27, %28 : vector<8x5x20xi1>, vector<8x5x20xf32>
    %cst_16 = arith.constant dense<0.000000e+00> : vector<8x5xf32>
    %30 = vector.multi_reduction <add>, %29, %cst_16 [2] : vector<8x5x20xf32> to vector<8x5xf32>
    %31 = vector.shape_cast %20 : vector<8x4xi32> to vector<8x4x1xi32>
    %32 = vector.broadcast %31 : vector<8x4x1xi32> to vector<8x4x20xi32>
    %33 = arith.cmpi eq, %32, %22 : vector<8x4x20xi32>
    %cst_17 = arith.constant 0.000000e+00 : f32
    %34 = vector.shape_cast %16 : vector<8x1x20xf32> to vector<8x1x20xf32>
    %35 = vector.broadcast %34 : vector<8x1x20xf32> to vector<8x4x20xf32>
    %36 = vector.broadcast %cst_17 : f32 to vector<8x4x20xf32>
    %37 = arith.select %33, %35, %36 : vector<8x4x20xi1>, vector<8x4x20xf32>
    %cst_18 = arith.constant dense<0.000000e+00> : vector<8x4xf32>
    %38 = vector.multi_reduction <add>, %37, %cst_18 [2] : vector<8x4x20xf32> to vector<8x4xf32>
    %cst_19 = arith.constant 0.000000e+00 : f32
    %39 = vector.broadcast %cst_19 : f32 to vector<8x116xf32>
    %40 = tpu.concatenate %14, %30, %38, %39 in 1 : vector<8x3xf32>, vector<8x5xf32>, vector<8x4xf32>, vector<8x116xf32> -> vector<8x128xf32>
    %c0_20 = arith.constant 0 : index
    %c0_21 = arith.constant 0 : index
    %41 = vector.load %arg6[%c0_20, %c0_21] : memref<8x128xf32, #tpu.memory_space<vmem>>, vector<8x128xf32>
    tpu.vector_store %arg6[%c0_20, %c0_21], %40 {strides = array<i32>} : memref<8x128xf32, #tpu.memory_space<vmem>>, vector<8x128xf32>,
    return
  }
  func.func @transform_0(%arg0: i32) -> (i32, i32, i32) {
    %c0_i32 = arith.constant 0 : i32
    %c0_i32_0 = arith.constant 0 : i32
    %c0_i32_1 = arith.constant 0 : i32
    return %arg0, %c0_i32, %c0_i32_0 : i32, i32, i32
  }
  func.func @transform_1(%arg0: i32) -> (i32, i32, i32) {
    %c0_i32 = arith.constant 0 : i32
    %c0_i32_0 = arith.constant 0 : i32
    %c0_i32_1 = arith.constant 0 : i32
    return %arg0, %c0_i32, %c0_i32_0 : i32, i32, i32
  }
  func.func @transform_2(%arg0: i32) -> (i32, i32) {
    %c0_i32 = arith.constant 0 : i32
    %c0_i32_0 = arith.constant 0 : i32
    return %arg0, %c0_i32 : i32, i32
  }
  func.func @transform_3(%arg0: i32) -> (i32, i32) {
    %c0_i32 = arith.constant 0 : i32
    %c0_i32_0 = arith.constant 0 : i32
    %c0_i32_1 = arith.constant 0 : i32
    return %c0_i32, %c0_i32_0 : i32, i32
  }
  func.func @transform_4(%arg0: i32) -> (i32, i32) {
    %c0_i32 = arith.constant 0 : i32
    %c0_i32_0 = arith.constant 0 : i32
    %c0_i32_1 = arith.constant 0 : i32
    return %c0_i32, %c0_i32_0 : i32, i32
  }
  func.func @transform_5(%arg0: i32) -> (i32, i32) {
    %c0_i32 = arith.constant 0 : i32
    %c0_i32_0 = arith.constant 0 : i32
    return %arg0, %c0_i32 : i32, i32
  }
}

</mosaic_0001>

<bundles_post_ra>
// kernel: aspect_augumentation_book_forward.1
= control target key start
LH: loop header
LB: loop body
LE: loop exit
PB: predicated region body
PF: predicated region fallthrough
CT: control target
= control target key end

     0   :  { %s1017_s18 = smov 0   ;;  %s1197_s0 = inlined_call_operand.vmem [shape: s32[2,8,5], index: 0, kind: input, shape index: {}]   ;;  %s1198_s1 = inlined_call_operand.vmem [shape: s32[2,8,4], index: 1, kind: input, shape index: {}]   ;;  %s1199_s2 = inlined_call_operand.vmem [shape: f32[16,32], index: 2, kind: input, shape index: {}]   ;;  %s1200_s3 = inlined_call_operand.vmem [shape: f32[32,3], index: 3, kind: input, shape index: {}]   ;;  %s1201_s4 = inlined_call_operand.vmem [shape: f32[20,32], index: 4, kind: input, shape index: {}]   ;;  %s1202_s5 = inlined_call_operand.vmem [shape: f32[16,128], index: 5, kind: output, shape index: {}]  }
   0x1 LB: > { %s904_s19 = sadd.s32 4294967295, %s981_s18   ;;  %p908_p0 = scmp.ge.s32.totalorder %s981_s18, 1  ;;  %s981_s18 = sphi %s1017_s18, %s15_s18  }
   0x2   : > { %p204_p1 = scmp.lt.s32.totalorder %s981_s18, 3 }
   0x4   : > { %p205_p2 = pnand %p908_p0, %p204_p1 }
   0x5   : > { %v255_v0 = vld [vmem:[%s1200_s3] sm:$0xff] (!%p205_p2)  ;;  %v256_v1 = vld [vmem:[%s1200_s3 + $0x8] sm:$0xff] (!%p205_p2)  ;;  %v257_v2 = vld [vmem:[%s1200_s3 + $0x10] sm:$0xff] (!%p205_p2)  ;;  %v433_v3 = vlaneseq (!%p205_p2)  ;;  %v983_v4 = vmov (!%p205_p2), 0.0|0.0   ;;  %vm984_vm0 = vmmov (!%p205_p2), 0   ;;  %v985_v7 = vmov (!%p205_p2), 0.0  }
   0x6   : > { %208 = sbr.rel (%p205_p2) target bundleno = 552 (0x228), region = 40  ;;  %949 = vmatprep.subr.bf16.mxu0 (!%p205_p2), %v983_v4  ;;  %v950_v5 = vpack.c.bf16 (!%p205_p2), %v256_v1, %v255_v0  ;;  %v258_v6 = vld [vmem:[%s1200_s3 + $0x18] sm:$0xff] (!%p205_p2)  ;;  %937 = vmatprep.mubr.msk.f32.mxu0 (!%p205_p2), %vm984_vm0, %v985_v7  ;;  %p238_p3 = scmp.lt.s32.totalorder (!%p205_p2), %s904_s19, 1  ;;  %vm262_vm1 = vcmask (!%p205_p2), 261120   ;;  %v259_v8 = vld [vmem:[%s1201_s4] sm:$0xff] (!%p205_p2)  ;;  %v260_v9 = vld [vmem:[%s1201_s4 + $0x8] sm:$0xff] (!%p205_p2) }
   0x7   : > { %955 = vmatprep.subr.bf16.mxu1 (!%p205_p2), %v983_v4  ;;  %v956_v10 = vpack.c.bf16 (!%p205_p2), %v260_v9, %v259_v8  ;;  %vm957_vm2 = vmpackc.low (!%p205_p2), %vm262_vm1, %vm262_vm1  ;;  %946 = vmatprep.mubr.msk.f32.mxu1 (!%p205_p2), %vm984_vm0, %v985_v7  ;;  %v1046_v11 = vshrl.u32 (!%p205_p2), %v433_v3, 7  ;;  %v953_v12 = vpack.c.bf16 (!%p205_p2), %v258_v6, %v257_v2  ;;  %v261_v19 = vld [vmem:[%s1201_s4 + $0x10] sm:$0xf] (!%p205_p2)  ;;  %v986_v42 = vmov (!%p205_p2), 1966171168  }
   0x8   : > { %951 = vmatpush3.bf16.msra.mxu0 (!%p205_p2), %v950_v5  ;;  %v431_v43 = vunpack.c.l.s4 (!%p205_p2), %v986_v42  ;;  %vm337_vm3 = vcmask (!%p205_p2), 23552   ;;  %v1105_v52 = vand.u32 (!%p205_p2), 127, %v433_v3  ;;  %vm594_vm6 = vcmask (!%p205_p2), 159744  }
   0x9   : > { %952 = vmatprep.subr.bf16.mxu0 (!%p205_p2), %v983_v4  ;;  %958 = vmatpush3.bf16.xpose.msk.msra.mxu1 (!%p205_p2), %vm957_vm2, %v956_v10  ;;  %v491_v13 = vsub.s32 (!%p205_p2), 1, %v1046_v11  ;;  %v498_v14 = vsub.s32 (!%p205_p2), 2, %v1046_v11  ;;  %v1065_v16 = vsub.s32 (!%p205_p2), 0, %v1046_v11  ;;  %v505_v20 = vsub.s32 (!%p205_p2), 3, %v1046_v11 }
   0xa   : > { %944 = vmatprep.subr.mxu1 (!%p205_p2), %v985_v7  ;;  %v512_v29 = vsub.s32 (!%p205_p2), 4, %v1046_v11  ;;  %v519_v31 = vsub.s32 (!%p205_p2), 5, %v1046_v11  ;;  %v526_v33 = vsub.s32 (!%p205_p2), 6, %v1046_v11  ;;  %v533_v35 = vsub.s32 (!%p205_p2), 7, %v1046_v11 }
   0xb   : > { %v432_v44 = vunpack.c.0.s8 (!%p205_p2), %v431_v43  ;;  %vm691_vm7 = vcmask (!%p205_p2), 158720  }
   0xc   : > { %954 = vmatpush3.bf16.msra.mxu0 (!%p205_p2), %v953_v12 }
   0xd   : > { %s1204_s19 = smov (!%p238_p3, %s904_s19), 1  ;;  %v435_v49 = vsub.s32 %v432_v44, %v1046_v11 }
   0xe   : > { %s1049_s7 = sshll.u32 %s1204_s19, 3 }
   0xf   : > { %s241_s10 = scalar_lea.vmem %s1197_s0, %s1049_s7  ;;  %s245_s13 = scalar_lea.vmem %s1198_s1, %s1049_s7 }
  0x10   : > { %s249_s16 = scalar_lea.vmem %s1199_s2, %s1049_s7  ;;  %v478_v15 = vld [vmem:[%s241_s10] sm:$0xff]  ;;  %s253_s22 = scalar_lea.vmem %s1202_s5, %s1049_s7 }
  0x11   : > { %v254_v17 = vld [vmem:[%s249_s16] sm:$0xff]  ;;  %v492_v18 = vrot.slane %v478_v15, %v491_v13  ;;  %v485_v21 = vrot.slane %v478_v15, %v1065_v16  ;;  %v499_v23 = vrot.slane %v478_v15, %v498_v14  ;;  %945 = vmatpush3.xpose.msk.msra.mxu1 %vm262_vm1, %v261_v19  ;;  %v506_v27 = vrot.slane %v478_v15, %v505_v20 }
  0x12   : > { %938 = vmatmul.mubr.msk.f32.vlgmr.msra.gmra.mrb[0].mxu0 %vm262_vm1, %v254_v17  ;;  %v1073_v22 = vld [vmem:[%s245_s13] sm:$0xff]  ;;  %v513_v30 = vrot.slane %v478_v15, %v512_v29  ;;  %v520_v32 = vrot.slane %v478_v15, %v519_v31  ;;  %v527_v34 = vrot.slane %v478_v15, %v526_v33  ;;  %v534_v36 = vrot.slane %v478_v15, %v533_v35 }
  0x13   : > { %494 = vbcast.lane.b32.xlu1 %v492_v18, 256  ;;  %487 = vbcast.lane.b32.xlu0 %v485_v21, 256  ;;  %v643_v24 = vrot.slane %v1073_v22, %v505_v20  ;;  %v622_v25 = vrot.slane %v1073_v22, %v1065_v16  ;;  %v629_v26 = vrot.slane %v1073_v22, %v491_v13 }
  0x14   : > { %947 = vmatmul.mubr.msk.f32.vlgmr.msra.gmra.mrb[0].mxu1 %vm262_vm1, %v254_v17  ;;  %v636_v28 = vrot.slane %v1073_v22, %v498_v14  ;;  %v671_v37 = vrot.slane %v1073_v22, %v533_v35 }
  0x17   : > { %501 = vbcast.lane.b32.xlu1 %v499_v23, 256  ;;  %645 = vbcast.lane.b32.xlu0 %v643_v24, 256 }
  0x1b   : > { %624 = vbcast.lane.b32.xlu1 %v622_v25, 256  ;;  %v650_v25 = vrot.slane %v1073_v22, %v512_v29 }
  0x1f   : > { %631 = vbcast.lane.b32.xlu1 %v629_v26, 256 }
  0x23   : > { %508 = vbcast.lane.b32.xlu1 %v506_v27, 256 }
  0x27   : > { %638 = vbcast.lane.b32.xlu1 %v636_v28, 256 }
  0x2b   : > { %515 = vbcast.lane.b32.xlu1 %v513_v30, 256 }
  0x2f   : > { %522 = vbcast.lane.b32.xlu1 %v520_v32, 256  ;;  %v657_v32 = vrot.slane %v1073_v22, %v519_v31 }
  0x33   : > { %529 = vbcast.lane.b32.xlu1 %v527_v34, 256 }
  0x37   : > { %536 = vbcast.lane.b32.xlu1 %v534_v36, 256 }
  0x3b   : > { %673 = vbcast.lane.b32.xlu1 %v671_v37, 256  ;;  %v664_v37 = vrot.slane %v1073_v22, %v526_v33 }
  0x85   : > { %v495_v38 = vpop.permute.xlu1 %494  ;;  %v488_v56 = vpop.permute.xlu0 %487 }
  0x86   : > { %vm538_vm5 = vcmp.eq.s32.totalorder %v488_v56, %v1105_v52  ;;  %vm539_vm8 = vcmp.eq.s32.totalorder %v495_v38, %v1105_v52 }
  0x89   : > { %v502_v39 = vpop.permute.xlu1 %501  ;;  %v646_v44 = vpop.permute.xlu0 %645 }
  0x8a   : > { %vm540_vm9 = vcmp.eq.s32.totalorder %v502_v39, %v1105_v52  ;;  %vm678_vm2 = vcmp.eq.s32.totalorder %v646_v44, %v1105_v52 }
  0x8d   : > { %v625_v40 = vpop.permute.xlu1 %624 }
  0x8e   : > { %vm675_vm4 = vcmp.eq.s32.totalorder %v625_v40, %v1105_v52 }
  0x91   : > { %v1093_v41 = vpop.permute.xlu1 %631 }
  0x92   : > { %vm676_vm0 = vcmp.eq.s32.totalorder %v1093_v41, %v1105_v52 }
  0x95   : > { %v509_v45 = vpop.permute.xlu1 %508 }
  0x96   : > { %vm541_vm11 = vcmp.eq.s32.totalorder %v509_v45, %v1105_v52 }
  0x99   : > { %v1102_v51 = vpop.permute.xlu1 %638 }
  0x9a   : > { %vm677_vm1 = vcmp.eq.s32.totalorder %v1102_v51, %v1105_v52 }
  0x9d   : > { %v516_v62 = vpop.permute.xlu1 %515 }
  0x9e   : > { %vm542_vm10 = vcmp.eq.s32.totalorder %v516_v62, %v1105_v52 }
  0xa1   : > { %v523_v12 = vpop.permute.xlu1 %522 }
  0xa2   : > { %vm543_vm12 = vcmp.eq.s32.totalorder %v523_v12, %v1105_v52 }
  0xa5   : > { %v530_v21 = vpop.permute.xlu1 %529 }
  0xa6   : > { %vm544_vm13 = vcmp.eq.s32.totalorder %v530_v21, %v1105_v52 }
  0xa9   : > { %v537_v34 = vpop.permute.xlu1 %536 }
  0xaa   : > { %vm545_vm14 = vcmp.eq.s32.totalorder %v537_v34, %v1105_v52 }
  0xad   : > { %v674_v38 = vpop.permute.xlu1 %673 }
  0xae   : > { %vm682_vm15 = vcmp.eq.s32.totalorder %v674_v38, %v1105_v52 }
  0xe5   : > { %v1095_v46 = vpop.f32.mrb[0].mxu0 }
  0xe6   : > { %v336_v47 = vmax.f32 %v1095_v46, 0.0  ;;  %v939_v48 = vpop.f32.mrb[1].mxu0 }
  0xe7   : > { %v424_v53 = vpop.f32.mrb[0].mxu1 }
  0xe8   : > { %v338_v50 = vsel %vm337_vm3, %v336_v47, -inf  ;;  %v429_v54 = vcombine.high %v424_v53, %v424_v53  ;;  %v436_v55 = vrot.slane %v424_v53, %v435_v49  ;;  %v948_v57 = vpop.f32.mrb[1].mxu1 }
  0xe9   : > { %339 = vmax.xlane.f32.xlu0 %v338_v50 }
  0xea   : > { %v443_v58 = vrot.slane %v429_v54, %v435_v49  ;;  %v444_v59 = vcombine.high %v436_v55, %v436_v55  ;;  %v452_v60 = vrot.slane %v436_v55, %v435_v49 }
  0xec   : > { %v549_v61 = vrot.slane %v452_v60, %v1065_v16  ;;  %v466_v63 = vrot.slane %v444_v59, %v435_v49  ;;  %v459_v0 = vrot.slane %v443_v58, %v435_v49  ;;  %v445_v1 = vcombine.high %v443_v58, %v443_v58 }
  0xed   : > { %v474_v2 = vcombine.high %v452_v60, %v452_v60 }
  0xee   : > { %v586_v3 = vsel %vm538_vm5, %v549_v61, 0.0  ;;  %v683_v4 = vsel %vm675_vm4, %v549_v61, 0.0  ;;  %v553_v5 = vrot.slane %v466_v63, %v1065_v16  ;;  %v1114_v6 = vrot.slane %v459_v0, %v1065_v16 }
  0xef   : > { %v595_v7 = vsel %vm594_vm6, %v586_v3, 0.0  ;;  %v557_v8 = vrot.slane %v474_v2, %v1065_v16  ;;  %v476_v9 = vcombine.high %v466_v63, %v466_v63  ;;  %v692_v13 = vsel %vm691_vm7, %v683_v4, 0.0 }
  0xf0   : > { %596 = vadd.xlane.f32.xlu1 %v595_v7  ;;  %v587_v10 = vsel %vm539_vm8, %v553_v5, 0.0  ;;  %v590_v15 = vsel %vm542_vm10, %v1114_v6, 0.0  ;;  %v473_v18 = vrot.slane %v445_v1, %v435_v49  ;;  %v475_v24 = vcombine.high %v459_v0, %v459_v0 }
  0xf1   : > { %v588_v14 = vsel %vm540_vm9, %v557_v8, 0.0  ;;  %v561_v17 = vrot.slane %v476_v9, %v1065_v16  ;;  %v607_v19 = vsel %vm594_vm6, %v590_v15, 0.0  ;;  %v598_v43 = vsel %vm594_vm6, %v587_v10, 0.0 }
  0xf2   : > { %v1125_v23 = vrot.slane %v473_v18, %v1065_v16  ;;  %v573_v28 = vrot.slane %v475_v24, %v1065_v16  ;;  %v477_v30 = vcombine.high %v473_v18, %v473_v18  ;;  %v601_v22 = vsel %vm594_vm6, %v588_v14, 0.0 }
  0xf3   : > { %v589_v20 = vsel %vm541_vm11, %v561_v17, 0.0  ;;  %v684_v33 = vsel %vm676_vm0, %v553_v5, 0.0  ;;  %v685_v48 = vsel %vm677_vm1, %v557_v8, 0.0  ;;  %v686_v50 = vsel %vm678_vm2, %v561_v17, 0.0 }
  0xf4   : > { %693 = vadd.xlane.f32.xlu1 %v692_v13  ;;  %v604_v26 = vsel %vm594_vm6, %v589_v20, 0.0  ;;  %v591_v27 = vsel %vm543_vm12, %v1125_v23, 0.0  ;;  %v592_v29 = vsel %vm544_vm13, %v573_v28, 0.0  ;;  %v577_v36 = vrot.slane %v477_v30, %v1065_v16 }
  0xf5   : > { %v610_v35 = vsel %vm594_vm6, %v591_v27, 0.0  ;;  %v613_v39 = vsel %vm594_vm6, %v592_v29, 0.0  ;;  %v695_v45 = vsel %vm691_vm7, %v684_v33, 0.0  ;;  %v698_v49 = vsel %vm691_vm7, %v685_v48, 0.0 }
  0xf6   : > { %v593_v40 = vsel %vm545_vm14, %v577_v36, 0.0  ;;  %v690_v42 = vsel %vm682_vm15, %v577_v36, 0.0  ;;  %v701_v41 = vsel %vm691_vm7, %v686_v50, 0.0  ;;  %v780_v13 = vadd.s32 4294967288, %v1105_v52 }
  0xf7   : > { %v616_v31 = vsel %vm594_vm6, %v593_v40, 0.0  ;;  %v713_v16 = vsel %vm691_vm7, %v690_v42, 0.0  ;;  %vm757_vm8 = vcmask 1041409   ;;  %vm761_vm9 = vcmask 1043459  }
  0xf8   : > { %608 = vadd.xlane.f32.xlu1 %v607_v19  ;;  %v783_v19 = vsub.s32 %v780_v13, %v1046_v11  ;;  %vm763_vm10 = vcmask 1044484   ;;  %vm765_vm11 = vcmask 1045509   ;;  %vm767_vm12 = vcmask 1046534  }
  0xf9   : > { %vm769_vm13 = vcmask 1047559   ;;  %vm822_vm14 = vcmask 64512   ;;  %vm824_vm15 = vcmask 97280  }
  0xfc   : > { %605 = vadd.xlane.f32.xlu1 %v604_v26 }
  0xff   : > { %652 = vbcast.lane.b32.xlu0 %v650_v25, 256 }
 0x100   : > { %611 = vadd.xlane.f32.xlu1 %v610_v35 }
 0x103   : > { %659 = vbcast.lane.b32.xlu0 %v657_v32, 256 }
 0x104   : > { %614 = vadd.xlane.f32.xlu1 %v613_v39 }
 0x107   : > { %666 = vbcast.lane.b32.xlu0 %v664_v37, 256 }
 0x108   : > { %617 = vadd.xlane.f32.xlu1 %v616_v31 }
 0x10c   : > { %714 = vadd.xlane.f32.xlu1 %v713_v16 }
 0x126   : > { %599 = vadd.xlane.f32.xlu0 %v598_v43 }
 0x12a   : > { %602 = vadd.xlane.f32.xlu0 %v601_v22 }
 0x12e   : > { %696 = vadd.xlane.f32.xlu0 %v695_v45 }
 0x132   : > { %699 = vadd.xlane.f32.xlu0 %v698_v49 }
 0x136   : > { %702 = vadd.xlane.f32.xlu0 %v701_v41 }
 0x176   : > { %v340_v53 = vpop.xlane.xlu0 %339 }
 0x177   : > { %v341_v54 = vsub.f32 %v336_v47, %v340_v53 }
 0x179   : > { %v342_v51 = vmul.f32 1.442695, %v341_v54 }
 0x17a   : > { %v653_v55 = vpop.permute.xlu0 %652 }
 0x17b   : > { %971 = vpow2.f32 %v342_v51  ;;  %vm679_vm4 = vcmp.eq.s32.totalorder %v653_v55, %v1105_v52 }
 0x17c   : > { %v687_v59 = vsel %vm679_vm4, %v1114_v6, 0.0  ;;  %v724_v6 = vadd.s32 4294967293, %v1105_v52 }
 0x17d   : > { %v704_v46 = vsel %vm691_vm7, %v687_v59, 0.0  ;;  %v597_v0 = vpop.xlane.xlu1 %596 }
 0x17e   : > { %v660_v56 = vpop.permute.xlu0 %659  ;;  %v727_v7 = vsub.s32 %v724_v6, %v1046_v11 }
 0x17f   : > { %vm680_vm5 = vcmp.eq.s32.totalorder %v660_v56, %v1105_v52 }
 0x180   : > { %v688_v47 = vsel %vm680_vm5, %v1125_v23, 0.0  ;;  %v728_v10 = vrot.slane %v597_v0, %v727_v7 }
 0x181   : > { %v707_v61 = vsel %vm691_vm7, %v688_v47, 0.0  ;;  %v694_v2 = vpop.xlane.xlu1 %693 }
 0x182   : > { %v667_v60 = vpop.permute.xlu0 %666  ;;  %v784_v25 = vrot.slane %v694_v2, %v783_v19 }
 0x183   : > { %vm681_vm6 = vcmp.eq.s32.totalorder %v667_v60, %v1105_v52 }
 0x184   : > { %v689_v62 = vsel %vm681_vm6, %v573_v28, 0.0 }
 0x185   : > { %v1161_v57 = vpop.eup %971  ;;  %v710_v63 = vsel %vm691_vm7, %v689_v62, 0.0  ;;  %v609_v4 = vpop.xlane.xlu1 %608  ;;  %vm759_vm7 = vcmask 1042434  }
 0x186   : > { %v344_v58 = vsel %vm337_vm3, %v1161_v57, 0.0  ;;  %v744_v26 = vrot.slane %v609_v4, %v727_v7 }
 0x187   : > { %345 = vadd.xlane.f32.xlu0 %v344_v58 }
 0x189   : > { %v606_v8 = vpop.xlane.xlu1 %605 }
 0x18a   : > { %v740_v20 = vrot.slane %v606_v8, %v727_v7 }
 0x18b   : > { %705 = vadd.xlane.f32.xlu0 %v704_v46 }
 0x18d   : > { %v612_v14 = vpop.xlane.xlu1 %611 }
 0x18e   : > { %v748_v30 = vrot.slane %v612_v14, %v727_v7 }
 0x18f   : > { %708 = vadd.xlane.f32.xlu0 %v707_v61 }
 0x191   : > { %v615_v24 = vpop.xlane.xlu1 %614 }
 0x192   : > { %v752_v29 = vrot.slane %v615_v24, %v727_v7 }
 0x193   : > { %711 = vadd.xlane.f32.xlu0 %v710_v63 }
 0x195   : > { %v618_v35 = vpop.xlane.xlu1 %617 }
 0x196   : > { %v756_v16 = vrot.slane %v618_v35, %v727_v7 }
 0x199   : > { %v715_v43 = vpop.xlane.xlu1 %714 }
 0x19a   : > { %v812_v50 = vrot.slane %v715_v43, %v783_v19 }
 0x1b3   : > { %v600_v1 = vpop.xlane.xlu0 %599 }
 0x1b4   : > { %v732_v12 = vrot.slane %v600_v1, %v727_v7 }
 0x1b6   : > { %v758_v18 = vsel %vm757_vm8, %v732_v12, %v728_v10 }
 0x1b7   : > { %v603_v3 = vpop.xlane.xlu0 %602 }
 0x1b8   : > { %v736_v15 = vrot.slane %v603_v3, %v727_v7 }
 0x1ba   : > { %v760_v21 = vsel %vm759_vm7, %v736_v15, %v758_v18 }
 0x1bb   : > { %v697_v5 = vpop.xlane.xlu0 %696  ;;  %v762_v52 = vsel %vm761_vm9, %v740_v20, %v760_v21 }
 0x1bc   : > { %v788_v27 = vrot.slane %v697_v5, %v783_v19  ;;  %v764_v11 = vsel %vm763_vm10, %v744_v26, %v762_v52 }
 0x1bd   : > { %v766_v38 = vsel %vm765_vm11, %v748_v30, %v764_v11 }
 0x1be   : > { %v813_v34 = vsel %vm757_vm8, %v788_v27, %v784_v25  ;;  %v768_v22 = vsel %vm767_vm12, %v752_v29, %v766_v38 }
 0x1bf   : > { %v700_v9 = vpop.xlane.xlu0 %699  ;;  %v770_v53 = vsel %vm769_vm13, %v756_v16, %v768_v22 }
 0x1c0   : > { %v792_v32 = vrot.slane %v700_v9, %v783_v19 }
 0x1c2   : > { %v814_v39 = vsel %vm759_vm7, %v792_v32, %v813_v34 }
 0x1c3   : > { %v703_v17 = vpop.xlane.xlu0 %702 }
 0x1c4   : > { %v796_v36 = vrot.slane %v703_v17, %v783_v19 }
 0x1c6   : > { %v815_v33 = vsel %vm761_vm9, %v796_v36, %v814_v39 }
 0x214   : > { %v346_v23 = vpop.xlane.xlu0 %345 }
 0x215   : > { %973 = vrcp.f32 %v346_v23 }
 0x218   : > { %v706_v28 = vpop.xlane.xlu0 %705 }
 0x219   : > { %v800_v40 = vrot.slane %v706_v28, %v783_v19 }
 0x21b   : > { %v816_v48 = vsel %vm763_vm10, %v800_v40, %v815_v33 }
 0x21c   : > { %v709_v37 = vpop.xlane.xlu0 %708 }
 0x21d   : > { %v804_v31 = vrot.slane %v709_v37, %v783_v19 }
 0x21f   : > { %v974_v42 = vpop.eup %973  ;;  %v817_v41 = vsel %vm765_vm11, %v804_v31, %v816_v48 }
 0x220   : > { %v348_v44 = vmul.f32 %v974_v42, %v1161_v57  ;;  %v712_v45 = vpop.xlane.xlu0 %711 }
 0x221   : > { %v808_v49 = vrot.slane %v712_v45, %v783_v19 }
 0x222   : > { %v821_v51 = vsel %vm337_vm3, %v348_v44, %v770_v53 }
 0x223   : > { %v818_v54 = vsel %vm767_vm12, %v808_v49, %v817_v41 }
 0x224   : > { %v819_v55 = vsel %vm769_vm13, %v812_v50, %v818_v54 }
 0x225   : > { %v823_v56 = vsel %vm822_vm14, %v821_v51, %v819_v55 }
 0x226   : > { %v825_v57 = vsel %vm824_vm15, %v823_v56, 0.0 }
 0x227   : > { %826 = vst [vmem:[%s253_s22] sm:$0xff] %v825_v57 }
 0x228 PF: > { %s15_s18 = sadd.s32 1, %s981_s18  }
 0x229   : > { %p12_p4 = scmp.ge.s32.totalorder %s15_s18, 4  }
 0x22b   :  { %14 = sbr.rel (!%p12_p4) target bundleno = 1 (0x1), region = 76 }

</bundles_post_ra>
